<compile_context>
chip_gen: v7x
topology: tpu7x:2x2x1
jax: 0.10.0
libtpu: 0.0.40
codegen_flags: <defaults>
</compile_context>

<pallas_src>
import functools

import jax
import jax.numpy as jnp
from jax.experimental import pallas as pl
from jax.experimental.pallas import tpu as pltpu


def _round_up(x, m):
    return (x + m - 1) // m * m


def _largest_divisor(dim, candidates):
    for c in candidates:
        if dim % c == 0:
            return c
    return dim  # fall back to full extent (always a legal block size)


# ---------------------------------------------------------------------------
# Fused patch-embedding kernel:
#   out[m, :] = (sum_k x[m, k] * W[k, :]) + pe_row(m)
# pe_row already folds in the cls token (see wrapper), so this single matmul
# grid produces the final `embeddings` rows directly.
# ---------------------------------------------------------------------------
def _patch_embed_kernel(x_ref, w_ref, pe_ref, o_ref, acc_ref):
    k = pl.program_id(2)

    @pl.when(k == 0)
    def _init():
        acc_ref[...] = jnp.zeros_like(acc_ref)

    acc_ref[...] += jnp.dot(
        x_ref[...], w_ref[...], preferred_element_type=jnp.float32
    )

    @pl.when(k == pl.num_programs(2) - 1)
    def _finalize():
        # Position-embedding (+cls) add fused into the accumulator drain, in
        # f32 (v5e VPU has no bf16 path); cast exactly once at the store.
        o_ref[...] = (
            acc_ref[...] + pe_ref[...].astype(jnp.float32)
        ).astype(o_ref.dtype)


def patch_embed_pallas(x_flat, w, pe_rows, blocks_per_batch, *, tm, tn, tk,
                       out_dtype):
    """x_flat: (M, K) rows, batch-major, M = B * N_tot with tm | N_tot.
    pe_rows: (N_tot, D) additive rows, shared across batches."""
    M, K = x_flat.shape
    D = w.shape[1]
    grid = (M // tm, D // tn, K // tk)

    return pl.pallas_call(
        _patch_embed_kernel,
        out_shape=jax.ShapeDtypeStruct((M, D), out_dtype),
        grid_spec=pltpu.PrefetchScalarGridSpec(
            num_scalar_prefetch=0,
            grid=grid,
            in_specs=[
                # Activations stream over (i, k).
                pl.BlockSpec((tm, tk), lambda i, j, k: (i, k)),
                # Weight block index independent of i -> VMEM-resident across
                # the whole M axis (DMA'd once per (j, k), not per M tile).
                pl.BlockSpec((tk, tn), lambda i, j, k: (k, j)),
                # PE rows repeat every `blocks_per_batch` M tiles; tiles never
                # cross a batch boundary by construction.
                pl.BlockSpec((tm, tn),
                             lambda i, j, k: (i % blocks_per_batch, j)),
            ],
            out_specs=pl.BlockSpec((tm, tn), lambda i, j, k: (i, j)),
            scratch_shapes=[pltpu.VMEM((tm, tn), jnp.float32)],
        ),
        compiler_params=pltpu.CompilerParams(
            dimension_semantics=("parallel", "parallel", "arbitrary"),
        ),
    )(x_flat, w, pe_rows)


def embeddings_forward(x, sex, age, origin, params, *, tm=256):
    """Eval-mode IRENE Embeddings.forward.

    x:      (B, N, D_in) float
    sex/age/origin: int32 indices, shape (B, 1) (or (B,))
    params:
      'w_patch'      (D_in, D)   Linear weight laid out so y = x @ w_patch
      'sex_table'    (2,   D)
      'age_table'    (120, D)
      'origin_table' (2,   D)
      'pos_emb'      (1, 1 + max_patches, D)
      'pe_sex' / 'pe_age' / 'pe_origin' / 'cls_token' : (1, 1, D)
    Returns (embeddings (B, N+1, D), sex_e, age_e, origin_e  each (B, 1, D)).
    """
    B, N, D_in = x.shape
    w = params["w_patch"]
    D = w.shape[1]
    pos = params["pos_emb"][0]          # (1 + max_patches, D)
    cls = params["cls_token"][0, 0]     # (D,)

    # ---- tile selection (kept modest so 2x-buffered tiles fit the default
    #      scoped VMEM on every generation: 16 MiB v5e, 32 MiB v6e/v7x) ------
    tn = _largest_divisor(D, (512, 384, 256, 128))   # lane-dense output
    tk = _largest_divisor(D_in, (512, 256, 128))
    tm = min(tm, _round_up(N + 1, 8))
    tm = _round_up(tm, 8)
    n_tot = _round_up(N + 1, tm)                     # padded per-batch rows
    blocks_per_batch = n_tot // tm

    # ---- build padded, cls-fused inputs ------------------------------------
    # Row 0 of every batch gets an all-zero activation row (contributes 0
    # through the matmul) and its additive row is (cls_token + PE[0]), so the
    # kernel emits the cls row directly.  Rows > N are zero padding, sliced
    # off afterwards.
    x_pad = jnp.zeros((B, n_tot, D_in), dtype=x.dtype)
    x_pad = x_pad.at[:, 1:N + 1, :].set(x)
    x_flat = x_pad.reshape(B * n_tot, D_in)

    pe_rows = jnp.zeros((n_tot, D), dtype=jnp.float32)
    pe_rows = pe_rows.at[0].set(
        pos[0].astype(jnp.float32) + cls.astype(jnp.float32))
    pe_rows = pe_rows.at[1:N + 1].set(pos[1:N + 1].astype(jnp.float32))

    out_flat = patch_embed_pallas(
        x_flat, w, pe_rows, blocks_per_batch,
        tm=tm, tn=tn, tk=tk, out_dtype=x.dtype)

    embeddings = out_flat.reshape(B, n_tot, D)[:, :N + 1, :]

    # ---- tiny demographic-table lookups (a few KB) -------------------------
    # Left to XLA's gather on purpose: DMAing whole tables into VMEM per grid
    # step would waste VMEM / DMA bandwidth the patch matmul needs.
    def _lookup(table, idx, pe):
        idx = jnp.asarray(idx).reshape(B, 1)
        return (jnp.take(table, idx, axis=0) + pe).astype(x.dtype)

    sex_emb = _lookup(params["sex_table"], sex, params["pe_sex"])
    age_emb = _lookup(params["age_table"], age, params["pe_age"])
    origin_emb = _lookup(params["origin_table"], origin, params["pe_origin"])

    # Dropout layers are identity in eval mode.
    return embeddings, sex_emb, age_emb, origin_emb


if __name__ == "__main__":
    key = jax.random.PRNGKey(0)
    # Small, tile-friendly shapes: N + 1 = 32 rows/batch, hidden = 128 lanes.
    B, N, D_in, D = 2, 31, 384, 128
    max_patches = 64

    ks = jax.random.split(key, 10)
    x = jax.random.normal(ks[0], (B, N, D_in), dtype=jnp.float32)
    sex = jnp.array([[0], [1]], dtype=jnp.int32)
    age = jnp.array([[23], [67]], dtype=jnp.int32)
    origin = jnp.array([[1], [0]], dtype=jnp.int32)

    params = {
        "w_patch": 0.02 * jax.random.normal(ks[1], (D_in, D), dtype=jnp.float32),
        "sex_table": jax.random.normal(ks[2], (2, D), dtype=jnp.float32),
        "age_table": jax.random.normal(ks[3], (120, D), dtype=jnp.float32),
        "origin_table": jax.random.normal(ks[4], (2, D), dtype=jnp.float32),
        "pos_emb": jax.random.normal(ks[5], (1, 1 + max_patches, D),
                                     dtype=jnp.float32),
        "pe_sex": jax.random.normal(ks[6], (1, 1, D), dtype=jnp.float32),
        "pe_age": jax.random.normal(ks[7], (1, 1, D), dtype=jnp.float32),
        "pe_origin": jax.random.normal(ks[8], (1, 1, D), dtype=jnp.float32),
        "cls_token": jax.random.normal(ks[9], (1, 1, D), dtype=jnp.float32),
    }

    # tm=16 exercises multiple M tiles per batch (PE modulo index map) and a
    # multi-step K reduction (D_in=384 -> 3 k steps of 128).
    fwd = jax.jit(functools.partial(embeddings_forward, tm=16))
    emb, sex_e, age_e, origin_e = fwd(x, sex, age, origin, params)
    jax.block_until_ready((emb, sex_e, age_e, origin_e))

    # -------- pure-JAX reference check --------------------------------------
    ref_patch = jnp.einsum("bnk,kd->bnd", x, params["w_patch"],
                           precision=jax.lax.Precision.HIGHEST)
    cls_tok = jnp.broadcast_to(params["cls_token"], (B, 1, D))
    ref_emb = (jnp.concatenate([cls_tok, ref_patch], axis=1)
               + params["pos_emb"][:, :N + 1])
    ref_sex = jnp.take(params["sex_table"], sex, axis=0) + params["pe_sex"]
    ref_age = jnp.take(params["age_table"], age, axis=0) + params["pe_age"]
    ref_org = (jnp.take(params["origin_table"], origin, axis=0)
               + params["pe_origin"])

    assert emb.shape == (B, N + 1, D)
    assert jnp.allclose(emb, ref_emb, atol=1e-3, rtol=1e-3), \
        float(jnp.max(jnp.abs(emb - ref_emb)))
    assert jnp.allclose(sex_e, ref_sex, atol=1e-5)
    assert jnp.allclose(age_e, ref_age, atol=1e-5)
    assert jnp.allclose(origin_e, ref_org, atol=1e-5)

    print("KERNEL_OK")
</pallas_src>

<mosaic_0001>
module attributes {stable_mosaic.version = 11 : i64} {
  func.func @_patch_embed_kernel(%arg0: i32, %arg1: i32, %arg2: i32, %arg3: memref<16x128xf32, #tpu.memory_space<vmem>>, %arg4: memref<128x128xf32, #tpu.memory_space<vmem>>, %arg5: memref<16x128xf32, #tpu.memory_space<vmem>>, %arg6: memref<16x128xf32, #tpu.memory_space<vmem>>, %arg7: memref<16x128xf32, #tpu.memory_space<vmem>>) attributes {dimension_semantics = [#tpu.dimension_semantics<parallel>, #tpu.dimension_semantics<parallel>, #tpu.dimension_semantics<arbitrary>], iteration_bounds = array<i64: 4, 1, 3>, scalar_prefetch = 0 : i64, scratch_operands = 1 : i64, tpu.core_type = #tpu.core_type<tc>, window_params = [{transform_indices = @transform_0, window_bounds = array<i64: 16, 128>}, {transform_indices = @transform_1, window_bounds = array<i64: 128, 128>}, {transform_indices = @transform_2, window_bounds = array<i64: 16, 128>}, {transform_indices = @transform_3, window_bounds = array<i64: 16, 128>}]} {
    %c0_i32 = arith.constant 0 : i32
    %0 = arith.cmpi eq, %arg2, %c0_i32 : i32
    %1 = arith.extui %0 : i1 to i32
    %c0_i32_0 = arith.constant 0 : i32
    %2 = arith.cmpi ne, %1, %c0_i32_0 : i32
    scf.if %2 {
      %cst_9 = arith.constant 0.000000e+00 : f32
      %12 = vector.broadcast %cst_9 : f32 to vector<16x128xf32>
      %c0_10 = arith.constant 0 : index
      %c0_11 = arith.constant 0 : index
      %13 = vector.load %arg7[%c0_10, %c0_11] : memref<16x128xf32, #tpu.memory_space<vmem>>, vector<16x128xf32>
      tpu.vector_store %arg7[%c0_10, %c0_11], %12 {strides = array<i32>} : memref<16x128xf32, #tpu.memory_space<vmem>>, vector<16x128xf32>,
    } else {
    }
    %c0 = arith.constant 0 : index
    %c0_1 = arith.constant 0 : index
    %3 = vector.load %arg7[%c0, %c0_1] : memref<16x128xf32, #tpu.memory_space<vmem>>, vector<16x128xf32>
    %c0_2 = arith.constant 0 : index
    %c0_3 = arith.constant 0 : index
    %4 = vector.load %arg3[%c0_2, %c0_3] : memref<16x128xf32, #tpu.memory_space<vmem>>, vector<16x128xf32>
    %c0_4 = arith.constant 0 : index
    %c0_5 = arith.constant 0 : index
    %5 = vector.load %arg4[%c0_4, %c0_5] : memref<128x128xf32, #tpu.memory_space<vmem>>, vector<128x128xf32>
    %cst = arith.constant dense<0.000000e+00> : vector<16x128xf32>
    %6 = tpu.matmul %4, %5, %cst {dimension_numbers = #tpu.dot_dimension_numbers<[1], [0], [0], [1], [0, 0, 1, 1], [], []>} : vector<16x128xf32>, vector<128x128xf32>, vector<16x128xf32> -> vector<16x128xf32>
    %7 = arith.addf %3, %6 : vector<16x128xf32>
    %c0_6 = arith.constant 0 : index
    %c0_7 = arith.constant 0 : index
    %8 = vector.load %arg7[%c0_6, %c0_7] : memref<16x128xf32, #tpu.memory_space<vmem>>, vector<16x128xf32>
    tpu.vector_store %arg7[%c0_6, %c0_7], %7 {strides = array<i32>} : memref<16x128xf32, #tpu.memory_space<vmem>>, vector<16x128xf32>,
    %c2_i32 = arith.constant 2 : i32
    %9 = arith.cmpi eq, %arg2, %c2_i32 : i32
    %10 = arith.extui %9 : i1 to i32
    %c0_i32_8 = arith.constant 0 : i32
    %11 = arith.cmpi ne, %10, %c0_i32_8 : i32
    scf.if %11 {
      %c0_9 = arith.constant 0 : index
      %c0_10 = arith.constant 0 : index
      %12 = vector.load %arg7[%c0_9, %c0_10] : memref<16x128xf32, #tpu.memory_space<vmem>>, vector<16x128xf32>
      %c0_11 = arith.constant 0 : index
      %c0_12 = arith.constant 0 : index
      %13 = vector.load %arg5[%c0_11, %c0_12] : memref<16x128xf32, #tpu.memory_space<vmem>>, vector<16x128xf32>
      %14 = arith.addf %12, %13 : vector<16x128xf32>
      %c0_13 = arith.constant 0 : index
      %c0_14 = arith.constant 0 : index
      %15 = vector.load %arg6[%c0_13, %c0_14] : memref<16x128xf32, #tpu.memory_space<vmem>>, vector<16x128xf32>
      tpu.vector_store %arg6[%c0_13, %c0_14], %14 {strides = array<i32>} : memref<16x128xf32, #tpu.memory_space<vmem>>, vector<16x128xf32>,
    } else {
    }
    return
  }
  func.func @transform_0(%arg0: i32, %arg1: i32, %arg2: i32) -> (i32, i32) {
    %c0_i32 = arith.constant 0 : i32
    return %arg0, %arg2 : i32, i32
  }
  func.func @transform_1(%arg0: i32, %arg1: i32, %arg2: i32) -> (i32, i32) {
    %c0_i32 = arith.constant 0 : i32
    return %arg2, %arg1 : i32, i32
  }
  func.func @transform_2(%arg0: i32, %arg1: i32, %arg2: i32) -> (i32, i32) {
    %c2_i32 = arith.constant 2 : i32
    %c0_i32 = arith.constant 0 : i32
    %0 = arith.cmpi eq, %c2_i32, %c0_i32 : i32
    %c1_i32 = arith.constant 1 : i32
    %1 = arith.select %0, %c1_i32, %c2_i32 : i32
    %2 = arith.remsi %arg0, %1 : i32
    %c0_i32_0 = arith.constant 0 : i32
    %3 = arith.cmpi ne, %2, %c0_i32_0 : i32
    %c0_i32_1 = arith.constant 0 : i32
    %4 = arith.cmpi slt, %2, %c0_i32_1 : i32
    %c0_i32_2 = arith.constant 0 : i32
    %5 = arith.cmpi slt, %1, %c0_i32_2 : i32
    %6 = arith.xori %4, %5 : i1
    %7 = arith.andi %6, %3 : i1
    %8 = arith.addi %2, %1 : i32
    %9 = arith.select %7, %8, %2 : i32
    %c0_i32_3 = arith.constant 0 : i32
    return %9, %arg1 : i32, i32
  }
  func.func @transform_3(%arg0: i32, %arg1: i32, %arg2: i32) -> (i32, i32) {
    %c0_i32 = arith.constant 0 : i32
    return %arg0, %arg1 : i32, i32
  }
}

</mosaic_0001>

<bundles_post_ra>
// kernel: embeddings_forward.1
= control target key start
LH: loop header
LB: loop body
LE: loop exit
PB: predicated region body
PF: predicated region fallthrough
CT: control target
= control target key end

     0   :  { %s1196_s0 = inlined_call_operand.vmem [shape: f32[64,384], index: 0, kind: input, shape index: {}]   ;;  %s1197_s1 = inlined_call_operand.vmem [shape: f32[384,128], index: 1, kind: input, shape index: {}]   ;;  %s1198_s2 = inlined_call_operand.vmem [shape: f32[32,128], index: 2, kind: input, shape index: {}]   ;;  %s1199_s3 = inlined_call_operand.hbm [shape: f32[64,128], index: 3, kind: output, shape index: {}]  }
   0x1   :  { %1204 = sst [smem:[#allocation10_spill]] %s1196_s0 }
   0x2   :  { %8 = vsyncpa [#allocation5], 0 }
   0x3   :  { %10 = vsyncpa [#allocation5 + $0x1], 0  ;;  %s977_s12 = smov 0   ;;  %s979_s13 = smov 0  }
   0x4   :  { %s981_s14 = smov 0   ;;  %s983_s15 = smov 0  }
   0x5   :  { %s985_s16 = smov 0   ;;  %s987_s17 = smov 0  }
   0x6   :  { %s989_s18 = smov 0   ;;  %s991_s19 = smov 0  }
   0x7   :  { %s993_s20 = smov 0   ;;  %s995_s21 = smov 0  }
   0x8 LB: > { %1205 = sst [smem:[#allocation7_spill]] %s947_s20  ;;  %s633_s22 = sadd.s32 4294967295, %s951_s21   ;;  %s951_s21 = sphi %s995_s21, %s16_s21   ;;  %s947_s20 = sphi %s993_s20, %s1215_s20   ;;  %s943_s19 = sphi %s991_s19, %s1222_s19   ;;  %s939_s18 = sphi %s989_s18, %s1213_s18   ;;  %s935_s17 = sphi %s987_s17, %s1221_s17   ;;  %s931_s16 = sphi %s985_s16, %s1220_s16   ;;  %s927_s15 = sphi %s983_s15, %s1219_s15   ;;  %s923_s14 = sphi %s981_s14, %s1218_s14   ;;  %s919_s13 = sphi %s979_s13, %s1217_s13   ;;  %s915_s12 = sphi %s977_s12, %s1216_s12  }
   0x9   : > { %s634_s23 = sadd.s32 4294967294, %s951_s21   ;;  %s28_s24 = sadd.s32 1, %s943_s19 }
   0xa   : > { %s35_s25 = sadd.s32 1, %s947_s20  ;;  %p29_p0 = scmp.ge.s32.totalorder %s28_s24, 3 }
   0xb   : > { %s44_s26 = sadd.s32 1, %s931_s16  ;;  %p51_p1 = scmp.ne.s32.totalorder %s931_s16, %s927_s15 }
   0xc   : > { %p52_p2 = scmp.eq.s32.totalorder %s951_s21, 0  ;;  %s1224_s24 = smov (%p29_p0, %s28_s24), 0 }
   0xd   : > { %1206 = sst [smem:[#allocation8_spill]] %s1224_s24  ;;  %s1226_s25 = smov (!%p29_p0, %s35_s25), %s947_s20 }
   0xe   : > { %s40_s27 = ssub.s32 %s943_s19, %s1224_s24  ;;  %p1040_p3 = por %p52_p2, %p51_p1 }
   0xf   : > { %p37_p4 = scmp.ge.s32.totalorder %s1226_s25, 4  ;;  %s152_s29 = sadd.s32 1, %s923_s14 }
  0x10   : > { %p162_p5 = scmp.ne.s32.totalorder %s923_s14, %s919_s13  ;;  %p163_p6 = scmp.eq.s32.totalorder %s633_s22, 11 }
  0x11   : > { %s1228_s25 = smov (%p37_p4, %s1226_s25), 0  ;;  %p168_p8 = scmp.ne.s32.totalorder %s919_s13, %s915_s12 }
  0x12   : > { %1208 = sst [smem:[#allocation9_spill]] %s1228_s25  ;;  %p1049_p7 = por %p163_p6, %p162_p5 }
  0x13   : > { %s39_s4 = ssub.s32 %s947_s20, %s1228_s25  ;;  %p169_p9 = scmp.eq.s32.totalorder %s634_s23, 11 }
  0x14   : > { %s41_s5 = sor.u32 %s40_s27, %s39_s4  ;;  %p150_p10 = scmp.eq.s32.totalorder %s39_s4, 0 }
  0x15   : > { %p42_p11 = scmp.eq.s32.totalorder %s41_s5, 0  ;;  %p1057_p12 = por %p169_p9, %p168_p8 }
  0x16   : > { %s1062_s7 = scalar_select %p150_p10, %s923_s14, %s152_s29  }
  0x17   : > { %s1065_s8 = scalar_select %p42_p11, %s931_s16, %s44_s26  }
  0x18   : > { %p642_p13 = scmp.ge.s32.totalorder %s951_s21, 12 }
  0x1a   : > { %185 = sbr.rel (%p642_p13) target bundleno = 44 (0x2c), region = 16 }
  0x21   : > { %188 = sbr.rel (!%p1040_p3) target bundleno = 44 (0x2c), region = 20  ;;  %s190_s9 = sand.u32 (%p1040_p3), 1, %s931_s16  }
  0x22   : > { %s750_s10 = smul.u32 (%p1040_p3), 6, %s947_s20  ;;  %s643_s11 = sshll.u32 (%p1040_p3), %s190_s9, 4 }
  0x23   : > { %s1211_s0 = sld [smem:[#allocation10_spill]] (%p1040_p3)  ;;  %s192_s26 = scalar_lea.vmem (%p1040_p3), [#allocation3], %s643_s11 }
  0x24   : > { %s195_s22 = sadd.s32 (%p1040_p3), %s943_s19, %s750_s10 }
  0x25   : > { %s646_s23 = sshll.u32 (%p1040_p3), %s195_s22, 3 }
  0x29   : > { %s197_s29 = scalar_lea.vmem %s1211_s0, %s646_s23 }
  0x2a   : > { %v227_v0 = vld [vmem:[%s197_s29] sm:$0xff]  ;;  %v229_v1 = vld [vmem:[%s197_s29 + $0x18] sm:$0xff] }
  0x2b   : > { %228 = vst [vmem:[%s192_s26] sm:$0xff] %v227_v0  ;;  %230 = vst [vmem:[%s192_s26 + $0x8] sm:$0xff] %v229_v1 }
  0x2c PF: > { %p647_p0 = scmp.ge.s32.totalorder %s951_s21, 1  ;;  %p283_p1 = scmp.lt.s32.totalorder %s951_s21, 13 }
  0x2e   : > { %p284_p2 = pnand %p647_p0, %p283_p1 }
  0x2f   : > { %s290_s28 = sand.u32 (!%p284_p2), 1, %s927_s15   ;;  %s1201_s5 = sand.u32 (!%p284_p2), 1, %s919_s13  }
  0x30   : > { %287 = sbr.rel (%p284_p2) target bundleno = 353 (0x161), region = 66  ;;  %s1080_s9 = sshll.u32 (!%p284_p2), %s290_s28, 4 }
  0x31   : > { %s649_s10 = sshll.u32 (!%p284_p2), %s1201_s5, 4  ;;  %s650_s11 = sshll.u32 (!%p284_p2), %s935_s17, 4 }
  0x32   : > { %p343_p3 = scmp.lt.s32.totalorder (!%p284_p2), %s650_s11, 47  ;;  %s352_s22 = ssub.s32 (!%p284_p2), 0, %s939_s18 }
  0x33   : > { %p351_p4 = scmp.lt.s32.totalorder (!%p284_p2), %s939_s18, 0  ;;  %s652_s23 = smin.u32 (!%p284_p2), %s939_s18, %s352_s22 }
  0x34   : > { %s354_s27 = sand.u32 (!%p284_p2), 1, %s652_s23   ;;  %s1099_s23 = scalar_lea.vmem (!%p284_p2), [#allocation4], %s649_s10 }
  0x35   : > { %s355_s29 = ssub.s32 (!%p284_p2), 0, %s354_s27  ;;  %p657_p8 = scmp.ne.s32.totalorder (!%p284_p2), %s935_s17, 0 }
  0x37   : > { %s1230_s11 = smov (!%p343_p3, %s650_s11), 47  ;;  %s1232_s29 = smov (!%p351_p4, %s355_s29), %s354_s27 }
  0x38   : > { %s651_s4 = sshll.u32 %s1230_s11, 3  ;;  %p654_p5 = scmp.lt.s32.totalorder %s1232_s29, 0  ;;  %v953_v2 = vmov (!%p657_p8), 0.0  }
  0x39   : > { %s1091_s25 = scalar_lea.vmem %s1197_s1, %s651_s4  ;;  %s361_s15 = sadd.s32 2, %s1232_s29  ;;  %389 = vst [vmem:[#allocation2] sm:$0xff] (!%p657_p8), %v953_v2  ;;  %390 = vst [vmem:[#allocation2 + $0x8] sm:$0xff] (!%p657_p8), %v953_v2 }
  0x3a   : > { %s1234_s15 = smov (!%p654_p5, %s361_s15), %s1232_s29  ;;  %s292_s11 = scalar_lea.vmem [#allocation3], %s1080_s9 }
  0x3b   : > { %s655_s28 = sshll.u32 %s1234_s15, 1  ;;  %388 = sbr.rel (%p657_p8) target bundleno = 66 (0x42), region = 74 }
  0x3c   : > { %p364_p6 = scmp.lt.s32.totalorder %s655_s28, 3 }
  0x3e   : > { %s1236_s28 = smov (!%p364_p6, %s655_s28), 3 }
  0x3f   : > { %s656_s5 = sshll.u32 %s1236_s28, 3 }
  0x40   : > { %s1096_s22 = scalar_lea.vmem %s1198_s2, %s656_s5 }
  0x42 PF: > { %v395_v3 = vld [vmem:[%s1091_s25] sm:$0xff]  ;;  %v396_v4 = vld [vmem:[%s1091_s25 + $0x8] sm:$0xff]  ;;  %v397_v5 = vld [vmem:[%s1091_s25 + $0x10] sm:$0xff]  ;;  %p658_p9 = scmp.ne.s32.totalorder %s935_s17, 2 }
  0x43   : > { %v718_v6 = vpack.c.bf16 %v396_v4, %v395_v3  ;;  %v398_v7 = vld [vmem:[%s1091_s25 + $0x18] sm:$0xff]  ;;  %v399_v9 = vld [vmem:[%s1091_s25 + $0x20] sm:$0xff]  ;;  %v400_v10 = vld [vmem:[%s1091_s25 + $0x28] sm:$0xff] }
  0x44   : > { %v722_v8 = vpack.c.bf16 %v398_v7, %v397_v5  ;;  %v726_v11 = vpack.c.bf16 %v400_v10, %v399_v9  ;;  %v393_v12 = vld [vmem:[%s292_s11] sm:$0xff]  ;;  %v402_v14 = vld [vmem:[%s1091_s25 + $0x38] sm:$0xff]  ;;  %v404_v17 = vld [vmem:[%s1091_s25 + $0x48] sm:$0xff] }
  0x45   : > { %719 = vmatprep.subr.bf16.mxu0 %v718_v6  ;;  %v401_v13 = vld [vmem:[%s1091_s25 + $0x30] sm:$0xff]  ;;  %715 = vmatprep.mubr.f32.mxu0 %v393_v12  ;;  %v403_v16 = vld [vmem:[%s1091_s25 + $0x40] sm:$0xff]  ;;  %v406_v20 = vld [vmem:[%s1091_s25 + $0x58] sm:$0xff] }
  0x46   : > { %721 = vmatpush3.bf16.msra.mxu0 %v718_v6  ;;  %v730_v15 = vpack.c.bf16 %v402_v14, %v401_v13  ;;  %v734_v18 = vpack.c.bf16 %v404_v17, %v403_v16  ;;  %v405_v19 = vld [vmem:[%s1091_s25 + $0x50] sm:$0xff]  ;;  %v407_v22 = vld [vmem:[%s1091_s25 + $0x60] sm:$0xff]  ;;  %v408_v23 = vld [vmem:[%s1091_s25 + $0x68] sm:$0xff] }
  0x47   : > { %723 = vmatprep.subr.bf16.mxu0 %v722_v8  ;;  %v738_v21 = vpack.c.bf16 %v406_v20, %v405_v19  ;;  %v742_v24 = vpack.c.bf16 %v408_v23, %v407_v22  ;;  %v409_v25 = vld [vmem:[%s1091_s25 + $0x70] sm:$0xff]  ;;  %v410_v26 = vld [vmem:[%s1091_s25 + $0x78] sm:$0xff]  ;;  %v392_v29 = vld [vmem:[#allocation2 + $0x8] sm:$0xff] }
  0x48   : > { %v746_v27 = vpack.c.bf16 %v410_v26, %v409_v25  ;;  %v394_v28 = vld [vmem:[%s292_s11 + $0x8] sm:$0xff]  ;;  %v391_v30 = vld [vmem:[#allocation2] sm:$0xff] }
  0x49   : > { %v496_v36 = vld [vmem:[%s1096_s22] sm:$0xff] (!%p658_p9)  ;;  %v497_v39 = vld [vmem:[%s1096_s22 + $0x8] sm:$0xff] (!%p658_p9) }
  0x4a   : > { %725 = vmatpush3.bf16.msra.mxu0 %v722_v8 }
  0x4b   : > { %727 = vmatprep.subr.bf16.mxu0 %v726_v11 }
  0x4e   : > { %729 = vmatpush3.bf16.msra.mxu0 %v726_v11 }
  0x4f   : > { %731 = vmatprep.subr.bf16.mxu0 %v730_v15 }
  0x52   : > { %733 = vmatpush3.bf16.msra.mxu0 %v730_v15 }
  0x53   : > { %735 = vmatprep.subr.bf16.mxu0 %v734_v18 }
  0x56   : > { %737 = vmatpush3.bf16.msra.mxu0 %v734_v18 }
  0x57   : > { %739 = vmatprep.subr.bf16.mxu0 %v738_v21 }
  0x5a   : > { %741 = vmatpush3.bf16.msra.mxu0 %v738_v21 }
  0x5b   : > { %743 = vmatprep.subr.bf16.mxu0 %v742_v24 }
  0x5e   : > { %745 = vmatpush3.bf16.msra.mxu0 %v742_v24 }
  0x5f   : > { %747 = vmatprep.subr.bf16.mxu0 %v746_v27 }
  0x62   : > { %749 = vmatpush3.bf16.msra.mxu0 %v746_v27 }
  0x65   : > { %716 = vmatmul.mubr.f32.vlgmr.msra.gmra.mrb[0].mxu0 %v394_v28 }
 0x136   : > { %493 = sbr.rel (%p658_p9) target bundleno = 327 (0x147), region = 78 }
 0x138   : > { %v717_v31 = vpop.f32.mrb[0].mxu0 }
 0x139   : > { %v487_v32 = vadd.f32 %v717_v31, %v392_v29  ;;  %v477_v33 = vpop.f32.mrb[1].mxu0 }
 0x13a   : > { %v486_v34 = vadd.f32 %v477_v33, %v391_v30 }
 0x13b   : > { %489 = vst [vmem:[#allocation2 + $0x8] sm:$0xff] %v487_v32 }
 0x13c   : > { %488 = vst [vmem:[#allocation2] sm:$0xff] %v486_v34 }
 0x142   : > { %v495_v37 = vld [vmem:[#allocation2 + $0x8] sm:$0xff] }
 0x143   : > { %v494_v35 = vld [vmem:[#allocation2] sm:$0xff]  ;;  %v499_v40 = vadd.f32 %v497_v39, %v495_v37 }
 0x144   : > { %v498_v38 = vadd.f32 %v496_v36, %v494_v35 }
 0x145   : > { %501 = vst [vmem:[%s1099_s23 + $0x8] sm:$0xff] %v499_v40 }
 0x146   : > { %500 = vst [vmem:[%s1099_s23] sm:$0xff] %v498_v38 }
 0x147 PF: > { %s664_s0 = sshll.u32 %s939_s18, 8  ;;  %s517_s25 = sshll.u32 %s1099_s23, 4  ;;  %s1134_s25 = int_to_ptr.vmem [resolvable:$true] %s517_s25 }
 0x148   : > { %s1131_s24 = scalar_lea.hbm %s1199_s3, %s664_s0  ;;  %s1212_s5 = sand.u32 1, %s919_s13  }
 0x149   : > { %s1138_s9 = scalar_lea.sflag [#allocation5], %s1212_s5  ;;  %s841_s10 = scalar_lea.vmem %s1134_s25, 256 }
 0x14a   : > { %p842_p10 = scmp.ne.s32.totalorder %s1134_s25, %s841_s10  ;;  %s954_s18 = smov [#allocation4]  }
 0x14b   : > { %s845_s27 = sshll.u32 %s954_s18, 4  ;;  %s846_s27 = int_to_ptr.vmem [resolvable:$false] %s845_s27 }
 0x14c   : > { %p843_p11 = pnand %p842_p10, %p1049_p7  ;;  %s847_s4 = scalar_lea.vmem %s846_s27, 512 }
 0x14d   : > { %p848_p0 = scmp.lt.s32.totalorder %s1134_s25, %s846_s27  ;;  %p849_p1 = scmp.lt.s32.totalorder %s847_s4, %s841_s10 }
 0x14e   : > { %p844_p13 = pneg %p843_p11 }
 0x14f   : > { %p850_p2 = por %p849_p1, %p848_p0 }
 0x151   : > { %p851_p3 = pnand %p850_p2, %p844_p13 }
 0x153   : > { %854 = shalt.err (!%p851_p3)
}
 0x154   : > { %s855_s29 = scalar_lea.hbm %s1131_s24, 256  ;;  %s859_s28 = scalar_lea.hbm %s1199_s3, 1024 }
 0x155   : > { %p856_p4 = scmp.ne.s32.totalorder %s1131_s24, %s855_s29  ;;  %p860_p8 = scmp.lt.u32.totalorder %s1131_s24, %s1199_s3 }
 0x156   : > { %p861_p9 = scmp.lt.u32.totalorder %s859_s28, %s855_s29  ;;  %p863_p11 = scmp.lt.u32.totalorder %s855_s29, %s1131_s24 }
 0x157   : > { %p857_p5 = pnand %p856_p4, %p1049_p7 }
 0x158   : > { %p862_p10 = por %p861_p9, %p860_p8 }
 0x159   : > { %p858_p6 = pneg %p857_p5 }
 0x15a   : > { %p864_p13 = por %p863_p11, %p862_p10 }
 0x15c   : > { %p865_p0 = pnand %p864_p13, %p858_p6 }
 0x15e   : > { %868 = shalt.err (!%p865_p0)
}
 0x15f   : > { %s955_s23 = smov 128   ;;  %s956_s0 = smov 8  }
 0x160   : > { %751 = dma.vmem_to_hbm [thread:$0]  (%p1049_p7), %s1134_s25, 256, %s1131_s24, %s1138_s9, %s955_s23, %s955_s23, %s956_s0  }
 0x161 PF: > { %p757_p1 = scmp.ge.s32.totalorder %s951_s21, 2  ;;  %s532_s17 = sand.u32 1, %s915_s12  }
 0x162   : > { %s533_s20 = scalar_lea.sflag [#allocation5], %s532_s17 }
 0x163   : > { %p754_p2 = pnand %p757_p1, %p1057_p12 }
 0x165   : > { %910 = dma.done.wait (!%p754_p2), %s533_s20, 256  }
 0x166   : > { %912 = vsyncadd (!%p754_p2), %s533_s20, 4294967040  ;;  %s16_s21 = sadd.s32 1, %s951_s21   ;;  %s1213_s18 = sld [smem:[#allocation7_spill]] }
 0x167   : > { %p13_p3 = scmp.ge.s32.totalorder %s16_s21, 14   ;;  %s1214_s30 = sld [smem:[#allocation8_spill]] }
 0x168   : > { %s1215_s20 = sld [smem:[#allocation9_spill]]  ;;  %s1216_s12 = smov %s919_s13 }
 0x169   : > { %s1217_s13 = smov %s923_s14  ;;  %s1218_s14 = smov %s1062_s7 }
 0x16a   : > { %s1219_s15 = smov %s931_s16  ;;  %s1220_s16 = smov %s1065_s8 }
 0x16b   : > { %s1221_s17 = smov %s943_s19  ;;  %15 = sbr.rel (!%p13_p3) target bundleno = 8 (0x8), region = 124 }
 0x16d   : > { %s1222_s19 = smov %s1214_s30 }
 0x172   :  { %538 = vsyncpa [#allocation5], 1 }
 0x173   :  { %540 = vsyncpa [#allocation5 + $0x1], 1 }

</bundles_post_ra>
